<compile_context>
chip_gen: v6e
topology: v6e:2x2x1
jax: 0.10.0
libtpu: 0.0.40
codegen_flags: <defaults>
</compile_context>

<pallas_src>
import jax
import jax.numpy as jnp
from jax.experimental import pallas as pl
from jax.experimental.pallas import tpu as pltpu

NUM_CLASSES = 340  # hard-coded in LSEP2.forward via _to_one_hot(target, 340)


def lsep_kernel(x_ref, tgt_ref, out_ref):
    """Per-row LSEP pair-sum terms for one batch tile.

    x_ref   : (TB, C) scores tile (any float dtype; upcast to f32 here)
    tgt_ref : (TB, 1) int32 target class per row
    out_ref : (TB, 1) f32 per-row sum_{n != t} exp(x_n - x_t)
    """
    x = x_ref[...].astype(jnp.float32)                 # (TB, C)
    tgt = tgt_ref[...]                                 # (TB, 1) int32
    tb, c = x.shape

    # Single exp per element, shifted by the per-row max (shift cancels
    # exactly in the ratio below but prevents spurious overflow).
    m = jnp.max(x, axis=-1, keepdims=True)             # (TB, 1)
    e = jnp.exp(x - m)                                 # (TB, C)  one EUP pass

    # Pick out the positive (target) lane per row via an in-kernel iota mask.
    col = jax.lax.broadcasted_iota(jnp.int32, (tb, c), 1)
    e_t = jnp.sum(jnp.where(col == tgt, e, 0.0), axis=-1, keepdims=True)

    # sum over negatives of exp(x_n - x_t) == (sum_c e_c - e_t) / e_t
    out_ref[...] = (jnp.sum(e, axis=-1, keepdims=True) - e_t) / e_t


def lsep_loss2(x, target, *, tile_b=1024):
    """Pallas implementation of LSEPLoss2.forward (forward pass only)."""
    B, C = x.shape
    assert C == NUM_CLASSES, "LSEP2 hard-codes 340 classes"

    # Choose a sublane-aligned batch tile (multiple of 8, capped at B).
    tb = min(tile_b, -(-B // 8) * 8)
    tb = max(8, (tb // 8) * 8)
    num_tiles = -(-B // tb)
    B_pad = num_tiles * tb

    if B_pad != B:
        # Padded rows produce finite garbage (x=0, t=0 -> term C-1) that is
        # sliced away before the final reduction.
        x = jnp.pad(x, ((0, B_pad - B), (0, 0)))
        target = jnp.pad(target, ((0, B_pad - B),))

    tgt2d = target.astype(jnp.int32).reshape(B_pad, 1)

    row_terms = pl.pallas_call(
        lsep_kernel,
        out_shape=jax.ShapeDtypeStruct((B_pad, 1), jnp.float32),
        grid_spec=pltpu.PrefetchScalarGridSpec(
            num_scalar_prefetch=0,
            grid=(num_tiles,),
            in_specs=[
                pl.BlockSpec((tb, C), lambda i: (i, 0)),   # scores, native dtype
                pl.BlockSpec((tb, 1), lambda i: (i, 0)),   # int32 targets
            ],
            out_specs=pl.BlockSpec((tb, 1), lambda i: (i, 0)),
        ),
        compiler_params=pltpu.CompilerParams(
            # Independent per-tile work: batch axis can shard across cores.
            dimension_semantics=("parallel",)),
    )(x, tgt2d)

    # Tiny final reduction + log1p in plain JAX (4 bytes/row).
    return jnp.log1p(jnp.sum(row_terms[:B, 0]))


def lsep_loss2_ref(x, target):
    """Pure-JAX reference with the same pairwise semantics as the torch loop."""
    onehot = jax.nn.one_hot(target.astype(jnp.int32), NUM_CLASSES)
    total = jnp.float32(0.0)
    for i in range(x.shape[0]):
        pos = onehot[i] > 0
        xp = x[i][pos]
        xn = x[i][~pos]
        total = total + jnp.sum(jnp.exp(xn[None, :] - xp[:, None]))
    return jnp.log(1.0 + total)


if __name__ == "__main__":
    # TODO(synk): only the forward pass of the autograd.Function is implemented
    # (the custom backward is not required for the forward-pass kernel).
    key = jax.random.PRNGKey(0)
    kx, kt = jax.random.split(key)

    # Case 1: batch divisible by the tile.
    B = 16
    x = jax.random.normal(kx, (B, NUM_CLASSES), dtype=jnp.float32)
    target = jax.random.randint(kt, (B,), 0, NUM_CLASSES, dtype=jnp.int32)
    loss = jax.block_until_ready(lsep_loss2(x, target))
    ref = lsep_loss2_ref(x, target)
    assert jnp.allclose(loss, ref, rtol=1e-5, atol=1e-5), (loss, ref)

    # Case 2: batch not divisible by 8 (exercises the padding path).
    B2 = 13
    loss2 = jax.block_until_ready(lsep_loss2(x[:B2], target[:B2]))
    ref2 = lsep_loss2_ref(x[:B2], target[:B2])
    assert jnp.allclose(loss2, ref2, rtol=1e-5, atol=1e-5), (loss2, ref2)

    print("KERNEL_OK")
</pallas_src>

<mosaic_0001>
module attributes {stable_mosaic.version = 11 : i64} {
  func.func @lsep_kernel(%arg0: i32, %arg1: memref<16x340xf32, #tpu.memory_space<vmem>>, %arg2: memref<16x1xi32, #tpu.memory_space<vmem>>, %arg3: memref<16x1xf32, #tpu.memory_space<vmem>>) attributes {dimension_semantics = [#tpu.dimension_semantics<parallel>], iteration_bounds = array<i64: 1>, scalar_prefetch = 0 : i64, scratch_operands = 0 : i64, tpu.core_type = #tpu.core_type<tc>, window_params = [{transform_indices = @transform_0, window_bounds = array<i64: 16, 340>}, {transform_indices = @transform_1, window_bounds = array<i64: 16, 1>}, {transform_indices = @transform_2, window_bounds = array<i64: 16, 1>}]} {
    %c0 = arith.constant 0 : index
    %c0_0 = arith.constant 0 : index
    %0 = vector.load %arg1[%c0, %c0_0] : memref<16x340xf32, #tpu.memory_space<vmem>>, vector<16x340xf32>
    %c0_1 = arith.constant 0 : index
    %c0_2 = arith.constant 0 : index
    %1 = vector.load %arg2[%c0_1, %c0_2] : memref<16x1xi32, #tpu.memory_space<vmem>>, vector<16x1xi32>
    %cst = arith.constant dense<0xFF800000> : vector<16xf32>
    %2 = vector.multi_reduction <maximumf>, %0, %cst [1] : vector<16x340xf32> to vector<16xf32>
    %3 = vector.shape_cast %2 : vector<16xf32> to vector<16x1xf32>
    %4 = vector.broadcast %3 : vector<16x1xf32> to vector<16x340xf32>
    %5 = arith.subf %0, %4 : vector<16x340xf32>
    %6 = math.exp %5 : vector<16x340xf32>
    %7 = tpu.iota {dimensions = array<i32: 1>} : vector<16x340xi32>
    %8 = vector.broadcast %1 : vector<16x1xi32> to vector<16x340xi32>
    %9 = arith.cmpi eq, %7, %8 : vector<16x340xi32>
    %cst_3 = arith.constant 0.000000e+00 : f32
    %10 = vector.broadcast %cst_3 : f32 to vector<16x340xf32>
    %11 = arith.select %9, %6, %10 : vector<16x340xi1>, vector<16x340xf32>
    %cst_4 = arith.constant dense<0.000000e+00> : vector<16xf32>
    %12 = vector.multi_reduction <add>, %11, %cst_4 [1] : vector<16x340xf32> to vector<16xf32>
    %13 = vector.shape_cast %12 : vector<16xf32> to vector<16x1xf32>
    %cst_5 = arith.constant dense<0.000000e+00> : vector<16xf32>
    %14 = vector.multi_reduction <add>, %6, %cst_5 [1] : vector<16x340xf32> to vector<16xf32>
    %15 = vector.shape_cast %14 : vector<16xf32> to vector<16x1xf32>
    %16 = arith.subf %15, %13 : vector<16x1xf32>
    %17 = arith.divf %16, %13 : vector<16x1xf32>
    %c0_6 = arith.constant 0 : index
    %c0_7 = arith.constant 0 : index
    %18 = vector.load %arg3[%c0_6, %c0_7] : memref<16x1xf32, #tpu.memory_space<vmem>>, vector<16x1xf32>
    tpu.vector_store %arg3[%c0_6, %c0_7], %17 {strides = array<i32>} : memref<16x1xf32, #tpu.memory_space<vmem>>, vector<16x1xf32>,
    return
  }
  func.func @transform_0(%arg0: i32) -> (i32, i32) {
    %c0_i32 = arith.constant 0 : i32
    %c0_i32_0 = arith.constant 0 : i32
    return %arg0, %c0_i32 : i32, i32
  }
  func.func @transform_1(%arg0: i32) -> (i32, i32) {
    %c0_i32 = arith.constant 0 : i32
    %c0_i32_0 = arith.constant 0 : i32
    return %arg0, %c0_i32 : i32, i32
  }
  func.func @transform_2(%arg0: i32) -> (i32, i32) {
    %c0_i32 = arith.constant 0 : i32
    %c0_i32_0 = arith.constant 0 : i32
    return %arg0, %c0_i32 : i32, i32
  }
}

</mosaic_0001>

<bundles_post_ra>
// kernel: tpu_custom_call.1
= control target key start
LH: loop header
LB: loop body
LE: loop exit
PB: predicated region body
PF: predicated region fallthrough
CT: control target
= control target key end

     0   :  { %7 = vsyncpa [#allocation3], 0  ;;  %s162_s9 = smov [#allocation2]   ;;  %s202_s0 = inlined_call_operand.hbm [shape: f32[16,340], index: 0, kind: input, shape index: {}]   ;;  %s203_s1 = inlined_call_operand.vmem [shape: s32[16,1], index: 1, kind: input, shape index: {}]   ;;  %s204_s2 = inlined_call_operand.vmem [shape: f32[16,1], index: 2, kind: output, shape index: {}]  }
   0x1   :  { %s13_s10 = sshll.u32 %s162_s9, 4  ;;  %s14_s10 = int_to_ptr.vmem [resolvable:$true] %s13_s10 }
   0x2   :  { %s148_s11 = scalar_lea.vmem %s14_s10, 768  ;;  %p153_p1 = scmp.lt.s32.totalorder %s14_s10, %s14_s10 }
   0x3   :  { %p149_p0 = scmp.ne.s32.totalorder %s14_s10, %s148_s11  ;;  %p154_p2 = scmp.lt.s32.totalorder %s148_s11, %s148_s11 }
   0x5   :  { %p155_p3 = por %p154_p2, %p153_p1 }
   0x7   :  { %p156_p4 = pnand %p155_p3, %p149_p0 }
   0x9   :  { %159 = shalt.err (!%p156_p4)
}
   0xa   :  { %s163_s12 = smov 384   ;;  %s164_s13 = smov 24  }
   0xb   :  { %19 = dma.hbm_to_vmem [thread:$0]  %s202_s0, 768, %s14_s10, [#allocation3], %s163_s12, %s163_s12, %s164_s13  }
   0xc   :  { %160 = dma.done.wait [#allocation3], 768  }
   0xd   :  { %161 = vsyncadd [#allocation3], 4294966528  ;;  %v165_v0 = vmov 0   ;;  %vm33_vm0 = vcmask 687104   ;;  %v25_v1 = vld [vmem:[#allocation2] sm:$0xff]  ;;  %v27_v2 = vld [vmem:[#allocation2 + $0x10] sm:$0xff]  ;;  %v62_v23 = vlaneseq }
   0xe   :  { %122 = vset.pattern.permute.xlu1 %v165_v0  ;;  %123 = vset.pattern.permute.xlu0 %v165_v0  ;;  %v26_v3 = vld [vmem:[#allocation2 + $0x8] sm:$0xff]  ;;  %v34_v4 = vsel %vm33_vm0, %v27_v2, -inf  ;;  %v28_v5 = vld [vmem:[#allocation2 + $0x18] sm:$0xff]  ;;  %v31_v9 = vld [vmem:[%s203_s1] sm:$0xff]  ;;  %vm110_vm7 = vcmask 7168  }
   0xf   :  { %v30_v6 = vld [vmem:[#allocation2 + $0x28] sm:$0xff]  ;;  %v35_v7 = vmax.f32 %v25_v1, %v34_v4  ;;  %v29_v10 = vld [vmem:[#allocation2 + $0x20] sm:$0xff]  ;;  %67 = vperm.xlu1 %122, %v31_v9   ;;  %v63_v30 = vand.u32 127, %v62_v23 }
  0x10   :  { %v39_v8 = vsel %vm33_vm0, %v30_v6, -inf  ;;  %v32_v13 = vld [vmem:[%s203_s1 + $0x8] sm:$0xff] }
  0x11   :  { %v40_v11 = vmax.f32 %v28_v5, %v39_v8  ;;  %v36_v12 = vmax.f32 %v35_v7, %v26_v3  ;;  %v64_v31 = vadd.s32 128, %v63_v30  ;;  %v65_v33 = vadd.s32 256, %v63_v30 }
  0x13   :  { %37 = vmax.xlane.f32.xlu0 %v36_v12  ;;  %v41_v14 = vmax.f32 %v40_v11, %v29_v10  ;;  %70 = vperm.xlu1 %122, %v32_v13  }
  0x17   :  { %42 = vmax.xlane.f32.xlu0 %v41_v14 }
  0x8a   :  { %v68_v32 = vpop.permute.xlu1 %67 }
  0x8b   :  { %vm72_vm1 = vcmp.eq.s32.totalorder %v63_v30, %v68_v32  ;;  %vm73_vm2 = vcmp.eq.s32.totalorder %v64_v31, %v68_v32  ;;  %vm74_vm3 = vcmp.eq.s32.totalorder %v65_v33, %v68_v32 }
  0x8e   :  { %v71_v36 = vpop.permute.xlu1 %70 }
  0x8f   :  { %vm75_vm4 = vcmp.eq.s32.totalorder %v63_v30, %v71_v36  ;;  %vm76_vm5 = vcmp.eq.s32.totalorder %v64_v31, %v71_v36  ;;  %vm77_vm6 = vcmp.eq.s32.totalorder %v65_v33, %v71_v36 }
  0x9c   :  { %v38_v15 = vpop.xlane.xlu0 %37 }
  0x9d   :  { %v44_v16 = vsub.f32 %v25_v1, %v38_v15  ;;  %v45_v17 = vsub.f32 %v26_v3, %v38_v15  ;;  %v46_v18 = vsub.f32 %v27_v2, %v38_v15 }
  0x9f   :  { %v50_v19 = vmul.f32 1.442695, %v44_v16  ;;  %v52_v20 = vmul.f32 1.442695, %v45_v17  ;;  %v54_v21 = vmul.f32 1.442695, %v46_v18 }
  0xa0   :  { %v43_v22 = vpop.xlane.xlu0 %42 }
  0xa1   :  { %124 = vpow2.f32 %v50_v19  ;;  %v47_v24 = vsub.f32 %v28_v5, %v43_v22  ;;  %v48_v25 = vsub.f32 %v29_v10, %v43_v22  ;;  %v49_v26 = vsub.f32 %v30_v6, %v43_v22 }
  0xa2   :  { %126 = vpow2.f32 %v52_v20 }
  0xa3   :  { %128 = vpow2.f32 %v54_v21  ;;  %v56_v27 = vmul.f32 1.442695, %v47_v24  ;;  %v58_v28 = vmul.f32 1.442695, %v48_v25  ;;  %v60_v29 = vmul.f32 1.442695, %v49_v26 }
  0xa5   :  { %130 = vpow2.f32 %v56_v27 }
  0xa6   :  { %132 = vpow2.f32 %v58_v28 }
  0xa7   :  { %134 = vpow2.f32 %v60_v29 }
  0xae   :  { %v125_v34 = vpop.eup %124 }
  0xaf   :  { %v127_v35 = vpop.eup %126  ;;  %v78_v37 = vsel %vm72_vm1, %v125_v34, 0.0 }
  0xb0   :  { %v129_v38 = vpop.eup %128  ;;  %v79_v39 = vsel %vm73_vm2, %v127_v35, 0.0  ;;  %v94_v46 = vadd.f32 %v127_v35, %v125_v34 }
  0xb1   :  { %v80_v40 = vsel %vm74_vm3, %v129_v38, 0.0  ;;  %v84_v41 = vadd.f32 %v79_v39, %v78_v37  ;;  %v95_v49 = vsel %vm33_vm0, %v129_v38, 0.0 }
  0xb2   :  { %v131_v42 = vpop.eup %130  ;;  %v85_v43 = vsel %vm33_vm0, %v80_v40, 0.0  ;;  %v96_v54 = vadd.f32 %v95_v49, %v94_v46 }
  0xb3   :  { %v133_v44 = vpop.eup %132  ;;  %v86_v45 = vadd.f32 %v85_v43, %v84_v41  ;;  %v81_v47 = vsel %vm75_vm4, %v131_v42, 0.0 }
  0xb4   :  { %v135_v48 = vpop.eup %134  ;;  %v82_v50 = vsel %vm76_vm5, %v133_v44, 0.0  ;;  %v99_v56 = vadd.f32 %v133_v44, %v131_v42 }
  0xb5   :  { %87 = vadd.xlane.f32.xlu0 %v86_v45  ;;  %v83_v51 = vsel %vm77_vm6, %v135_v48, 0.0  ;;  %v89_v52 = vadd.f32 %v82_v50, %v81_v47  ;;  %v100_v57 = vsel %vm33_vm0, %v135_v48, 0.0 }
  0xb6   :  { %v90_v53 = vsel %vm33_vm0, %v83_v51, 0.0  ;;  %v101_v58 = vadd.f32 %v100_v57, %v99_v56 }
  0xb7   :  { %v91_v55 = vadd.f32 %v90_v53, %v89_v52 }
  0xb9   :  { %97 = vadd.xlane.f32.xlu0 %v96_v54  ;;  %92 = vadd.xlane.f32.xlu1 %v91_v55 }
  0xbd   :  { %102 = vadd.xlane.f32.xlu0 %v101_v58 }
 0x13e   :  { %v88_v59 = vpop.xlane.xlu0 %87 }
 0x13f   :  { %136 = vrcp.f32 %v88_v59 }
 0x142   :  { %v93_v60 = vpop.xlane.xlu1 %92  ;;  %v98_v61 = vpop.xlane.xlu0 %97 }
 0x143   :  { %138 = vrcp.f32 %v93_v60  ;;  %v104_v62 = vsub.f32 %v98_v61, %v88_v59 }
 0x146   :  { %v103_v0 = vpop.xlane.xlu0 %102 }
 0x147   :  { %v105_v2 = vsub.f32 %v103_v0, %v93_v60 }
 0x14c   :  { %v137_v63 = vpop.eup %136 }
 0x14d   :  { %v107_v1 = vmul.f32 %v137_v63, %v104_v62 }
 0x14f   :  { %111 = vst.msk [vmem:[%s204_s2] sm:$0xff] %vm110_vm7, %v107_v1 }
 0x150   :  { %v139_v3 = vpop.eup %138 }
 0x151   :  { %v109_v4 = vmul.f32 %v139_v3, %v105_v2 }
 0x153   :  { %112 = vst.msk [vmem:[%s204_s2 + $0x8] sm:$0xff] %vm110_vm7, %v109_v4 }
 0x154   :  { %117 = vsyncpa [#allocation3], 1 }

</bundles_post_ra>
